<compile_context>
chip_gen: v7x
topology: tpu7x:2x2x1
jax: 0.10.0
libtpu: 0.0.40
codegen_flags: <defaults>
</compile_context>

<pallas_src>
import jax
import jax.numpy as jnp
import numpy as np
from jax import lax
from jax.experimental import pallas as pl
from jax.experimental.pallas import tpu as pltpu

# ----------------------------- problem sizes -------------------------------
B = 2        # batch size
T = 8        # max number of tokens (pad_sequence target length)
W = 16       # number of wordpieces produced by the transformer tokenizer
V = 32       # synthetic FastText vocabulary size
DW = 128     # synthetic FastText dim   (real module: 300)
H = 128      # synthetic transformer hidden dim (real module: 768)
LP = 4       # n_layers_pooling
FEAT = DW + H


# ------------------------------- kernel ------------------------------------
def udpipe2_preproc_kernel(
    lens_ref,    # SMEM (B,)          int32  (scalar prefetch) token lengths
    ids_ref,     # SMEM (B, T)        int32  (scalar prefetch) FastText row ids
    aux_ref,     # VMEM (1, 2, W)     int32  [0]=first-wordpiece mask, [1]=dest slot
    hid_ref,     # VMEM (1, LP, W, H) f32    last LP transformer hidden states
    table_ref,   # HBM  (V, DW)       f32    FastText table (memory_space=pl.ANY)
    out_ref,     # VMEM (T, FEAT)     f32    this sequence's pad_sequence slab
    wemb_buf,    # VMEM (T, DW)       f32    DMA gather staging buffer (scratch)
    dma_sems,    # DMA semaphores (T,)
):
    b = pl.program_id(0)

    # ---- 1. word embeddings: HBM row-DMA gather (O(T*DW) bytes, no O(V) work) ----
    for t in range(T):                                   # T is small & static
        idx = jnp.clip(ids_ref[b, t], 0, V - 1)          # clamp pad ids -> no OOB DMA
        pltpu.make_async_copy(table_ref.at[pl.ds(idx, 1)],
                              wemb_buf.at[pl.ds(t, 1)],
                              dma_sems.at[t]).start()

    # ---- 2. context embeddings (computed while the gather DMAs are in flight) ----
    # LP-layer "average" un-fused from the matmul: pre-sum the LP slabs on the
    # VPU and fold 1/LP into the selection matrix -> contraction depth is W, not LP*W.
    hsum = hid_ref[0, 0]
    for l in range(1, LP):
        hsum = hsum + hid_ref[0, l]                                   # (W, H)

    seq_len = lens_ref[b]
    row_iota = lax.broadcasted_iota(jnp.int32, (T, 1), 0)             # (T, 1)
    valid = (row_iota < seq_len).astype(jnp.float32)                  # pad_sequence mask
    t_iota = lax.broadcasted_iota(jnp.int32, (T, W), 0)               # (T, W)

    aux = aux_ref[0]                                                  # (2, W) int32
    maskf = aux[0:1, :].astype(jnp.float32)                           # (1, W) first-wp mask
    pos = aux[1:2, :]                                                 # (1, W) dest token slot

    # sel[t, w] = 1/LP  iff wordpiece w is the (t+1)-th first wordpiece of this
    # sequence and t < token_lens[b]  (extras beyond T/len_b are silently dropped).
    sel = ((pos == t_iota).astype(jnp.float32) * maskf * valid) * (1.0 / LP)   # (T, W)
    cemb = jnp.dot(sel, hsum, preferred_element_type=jnp.float32)              # (T, H)
    out_ref[:, DW:] = cemb                                            # 128-aligned store

    # ---- finish the gather, zero padded tokens, store the word-embedding slab ----
    for t in range(T):
        pltpu.make_async_copy(table_ref.at[pl.ds(0, 1)],
                              wemb_buf.at[pl.ds(t, 1)],
                              dma_sems.at[t]).wait()
    out_ref[:, :DW] = wemb_buf[...] * valid                           # 128-aligned store


# ------------------------------- wrapper ------------------------------------
@jax.jit
def udpipe2_preprocess(token_lens, token_ids, word_table, hidden_last4,
                       offsets0, offsets1):
    """UDPipe2PreProcessor.forward (pre-tokenized path).

    Returns embeddings shaped [T, B, DW + H] (pad_sequence, batch_first=False).
    """
    lens = token_lens.astype(jnp.int32)                    # (B,)
    ids = token_ids.reshape(B, T).astype(jnp.int32)        # (B, T)

    # First-wordpiece mask and its destination token slot (inclusive prefix
    # sum - 1), packed into one small int array: tiny index plumbing done once
    # in XLA instead of per-b M=1 matmuls in the kernel.
    mask = jnp.logical_and(offsets0 == 0, offsets1 != 0)               # (B, W) bool
    pos = jnp.cumsum(mask.astype(jnp.int32), axis=1) - 1               # (B, W)
    aux = jnp.stack([mask.astype(jnp.int32), pos], axis=1)             # (B, 2, W)

    grid_spec = pltpu.PrefetchScalarGridSpec(
        num_scalar_prefetch=2,                 # lens, ids -> SMEM (also DMA addresses)
        grid=(B,),
        in_specs=[
            pl.BlockSpec((1, 2, W), lambda b, lens, ids: (b, 0, 0)),          # aux
            pl.BlockSpec((1, LP, W, H), lambda b, lens, ids: (b, 0, 0, 0)),   # hidden states
            pl.BlockSpec(memory_space=pl.ANY),                                # table stays in HBM
        ],
        out_specs=pl.BlockSpec((T, FEAT), lambda b, lens, ids: (0, b)),
        scratch_shapes=[pltpu.VMEM((T, DW), jnp.float32),
                        pltpu.SemaphoreType.DMA((T,))],
    )

    out_flat = pl.pallas_call(
        udpipe2_preproc_kernel,
        out_shape=jax.ShapeDtypeStruct((T, B * FEAT), jnp.float32),
        grid_spec=grid_spec,
        compiler_params=pltpu.CompilerParams(dimension_semantics=("parallel",)),
    )(lens, ids, aux, hidden_last4, word_table)

    # [T, B*FEAT] -> [T, B, FEAT] is a free minor-dim split (pad_sequence layout).
    return out_flat.reshape(T, B, FEAT)


# ------------------------------ reference -----------------------------------
def reference(token_lens, token_ids, word_table, hidden_last4, off0, off1):
    token_lens = np.asarray(token_lens)
    token_ids = np.asarray(token_ids)
    word_table = np.asarray(word_table)
    hidden_last4 = np.asarray(hidden_last4)
    off0 = np.asarray(off0)
    off1 = np.asarray(off1)

    out = np.zeros((T, B, FEAT), dtype=np.float32)
    for b in range(B):
        l = int(token_lens[b])
        ids = token_ids[b, :, 0]
        wemb = word_table[ids][:l]                                     # [l, DW]
        wp_ce = hidden_last4[b].mean(axis=0)                           # [W, H]
        mask = np.logical_and(off0[b] == 0, off1[b] != 0)
        cemb = wp_ce[mask]                                             # [k, H]
        cemb = np.pad(cemb, ((0, l - cemb.shape[0]), (0, 0)))          # F.pad
        seq = np.concatenate([wemb, cemb], axis=-1)                    # [l, DW+H]
        out[:l, b, :] = seq                                            # pad_sequence
    return out


# -------------------------------- main ---------------------------------------
if __name__ == "__main__":
    key = jax.random.PRNGKey(0)
    k1, k2, k3 = jax.random.split(key, 3)

    token_lens = jnp.array([8, 5], dtype=jnp.int32)                    # per-seq lengths
    token_ids = jax.random.randint(k1, (B, T, 1), 1, V, dtype=jnp.int32)
    word_table = jax.random.normal(k2, (V, DW), dtype=jnp.float32) * 0.1
    hidden_last4 = jax.random.normal(k3, (B, LP, W, H), dtype=jnp.float32) * 0.1

    # Synthetic offset mappings: [CLS]=(0,0), first wordpiece=(0,4),
    # continuation=(4,7), padding/[SEP]=(0,0).  Exactly token_lens[b] first
    # wordpieces per sequence.
    off0_np = np.zeros((B, W), dtype=np.int32)
    off1_np = np.zeros((B, W), dtype=np.int32)
    for b in range(B):
        p = 1  # position 0 is [CLS]
        for tok in range(int(token_lens[b])):
            off0_np[b, p], off1_np[b, p] = 0, 4                        # first wp
            p += 1
            if tok % 2 == 0 and p < W - 1:                             # a continuation
                off0_np[b, p], off1_np[b, p] = 4, 7
                p += 1
    offsets0 = jnp.asarray(off0_np)
    offsets1 = jnp.asarray(off1_np)

    out = udpipe2_preprocess(token_lens, token_ids, word_table,
                             hidden_last4, offsets0, offsets1)
    out = jax.block_until_ready(out)

    ref = reference(token_lens, token_ids, word_table,
                    hidden_last4, offsets0, offsets1)
    np.testing.assert_allclose(np.asarray(out), ref, rtol=1e-5, atol=1e-5)

    print("KERNEL_OK")
</pallas_src>

<mosaic_0001>
module attributes {stable_mosaic.version = 11 : i64} {
  func.func @udpipe2_preproc_kernel(%arg0: i32, %arg1: memref<2xi32, #tpu.memory_space<smem>>, %arg2: memref<2x8xi32, #tpu.memory_space<smem>>, %arg3: memref<1x2x16xi32, #tpu.memory_space<vmem>>, %arg4: memref<1x4x16x128xf32, #tpu.memory_space<vmem>>, %arg5: memref<32x128xf32, #tpu.memory_space<any>>, %arg6: memref<8x256xf32, #tpu.memory_space<vmem>>, %arg7: memref<8x128xf32, #tpu.memory_space<vmem>>, %arg8: memref<8x!tpu.dma_semaphore, #tpu.memory_space<semaphore_mem>>) attributes {dimension_semantics = [#tpu.dimension_semantics<parallel>], iteration_bounds = array<i64: 2>, scalar_prefetch = 2 : i64, scratch_operands = 2 : i64, tpu.core_type = #tpu.core_type<tc>, window_params = [{transform_indices = @transform_0, window_bounds = array<i64: 1, 2, 16>}, {transform_indices = @transform_1, window_bounds = array<i64: 1, 4, 16, 128>}, {}, {transform_indices = @transform_3, window_bounds = array<i64: 8, 256>}]} {
    %0 = arith.index_cast %arg0 : i32 to index
    %c0 = arith.constant 0 : index
    %1 = memref.load %arg2[%0, %c0] : memref<2x8xi32, #tpu.memory_space<smem>>
    %c0_i32 = arith.constant 0 : i32
    %c31_i32 = arith.constant 31 : i32
    %2 = arith.maxsi %c0_i32, %1 : i32
    %3 = arith.minsi %c31_i32, %2 : i32
    %c0_i32_0 = arith.constant 0 : i32
    %c0_i32_1 = arith.constant 0 : i32
    %4 = tpu.memref_slice %arg5[%3, %c0_i32_1] : memref<32x128xf32, #tpu.memory_space<any>> -> memref<1x128xf32, #tpu.memory_space<any>>
    %c0_i32_2 = arith.constant 0 : i32
    %c0_i32_3 = arith.constant 0 : i32
    %5 = tpu.memref_slice %arg7[%c0_i32_2, %c0_i32_3] : memref<8x128xf32, #tpu.memory_space<vmem>> -> memref<1x128xf32, #tpu.memory_space<vmem>>
    %6 = tpu.memref_slice %arg8[%c0_i32_0] : memref<8x!tpu.dma_semaphore, #tpu.memory_space<semaphore_mem>> -> memref<1x!tpu.dma_semaphore, #tpu.memory_space<semaphore_mem>>
    %7 = tpu.memref_squeeze %6 : memref<1x!tpu.dma_semaphore, #tpu.memory_space<semaphore_mem>> -> memref<!tpu.dma_semaphore, #tpu.memory_space<semaphore_mem>>
    tpu.enqueue_dma source(%4 : memref<1x128xf32, #tpu.memory_space<any>>) target(%5 : memref<1x128xf32, #tpu.memory_space<vmem>>) target_semaphore(%7 : memref<!tpu.dma_semaphore, #tpu.memory_space<semaphore_mem>>)
    %8 = arith.index_cast %arg0 : i32 to index
    %c1 = arith.constant 1 : index
    %9 = memref.load %arg2[%8, %c1] : memref<2x8xi32, #tpu.memory_space<smem>>
    %c0_i32_4 = arith.constant 0 : i32
    %c31_i32_5 = arith.constant 31 : i32
    %10 = arith.maxsi %c0_i32_4, %9 : i32
    %11 = arith.minsi %c31_i32_5, %10 : i32
    %c1_i32 = arith.constant 1 : i32
    %c0_i32_6 = arith.constant 0 : i32
    %12 = tpu.memref_slice %arg5[%11, %c0_i32_6] : memref<32x128xf32, #tpu.memory_space<any>> -> memref<1x128xf32, #tpu.memory_space<any>>
    %c1_i32_7 = arith.constant 1 : i32
    %c0_i32_8 = arith.constant 0 : i32
    %13 = tpu.memref_slice %arg7[%c1_i32_7, %c0_i32_8] : memref<8x128xf32, #tpu.memory_space<vmem>> -> memref<1x128xf32, #tpu.memory_space<vmem>>
    %14 = tpu.memref_slice %arg8[%c1_i32] : memref<8x!tpu.dma_semaphore, #tpu.memory_space<semaphore_mem>> -> memref<1x!tpu.dma_semaphore, #tpu.memory_space<semaphore_mem>>
    %15 = tpu.memref_squeeze %14 : memref<1x!tpu.dma_semaphore, #tpu.memory_space<semaphore_mem>> -> memref<!tpu.dma_semaphore, #tpu.memory_space<semaphore_mem>>
    tpu.enqueue_dma source(%12 : memref<1x128xf32, #tpu.memory_space<any>>) target(%13 : memref<1x128xf32, #tpu.memory_space<vmem>>) target_semaphore(%15 : memref<!tpu.dma_semaphore, #tpu.memory_space<semaphore_mem>>)
    %16 = arith.index_cast %arg0 : i32 to index
    %c2 = arith.constant 2 : index
    %17 = memref.load %arg2[%16, %c2] : memref<2x8xi32, #tpu.memory_space<smem>>
    %c0_i32_9 = arith.constant 0 : i32
    %c31_i32_10 = arith.constant 31 : i32
    %18 = arith.maxsi %c0_i32_9, %17 : i32
    %19 = arith.minsi %c31_i32_10, %18 : i32
    %c2_i32 = arith.constant 2 : i32
    %c0_i32_11 = arith.constant 0 : i32
    %20 = tpu.memref_slice %arg5[%19, %c0_i32_11] : memref<32x128xf32, #tpu.memory_space<any>> -> memref<1x128xf32, #tpu.memory_space<any>>
    %c2_i32_12 = arith.constant 2 : i32
    %c0_i32_13 = arith.constant 0 : i32
    %21 = tpu.memref_slice %arg7[%c2_i32_12, %c0_i32_13] : memref<8x128xf32, #tpu.memory_space<vmem>> -> memref<1x128xf32, #tpu.memory_space<vmem>>
    %22 = tpu.memref_slice %arg8[%c2_i32] : memref<8x!tpu.dma_semaphore, #tpu.memory_space<semaphore_mem>> -> memref<1x!tpu.dma_semaphore, #tpu.memory_space<semaphore_mem>>
    %23 = tpu.memref_squeeze %22 : memref<1x!tpu.dma_semaphore, #tpu.memory_space<semaphore_mem>> -> memref<!tpu.dma_semaphore, #tpu.memory_space<semaphore_mem>>
    tpu.enqueue_dma source(%20 : memref<1x128xf32, #tpu.memory_space<any>>) target(%21 : memref<1x128xf32, #tpu.memory_space<vmem>>) target_semaphore(%23 : memref<!tpu.dma_semaphore, #tpu.memory_space<semaphore_mem>>)
    %24 = arith.index_cast %arg0 : i32 to index
    %c3 = arith.constant 3 : index
    %25 = memref.load %arg2[%24, %c3] : memref<2x8xi32, #tpu.memory_space<smem>>
    %c0_i32_14 = arith.constant 0 : i32
    %c31_i32_15 = arith.constant 31 : i32
    %26 = arith.maxsi %c0_i32_14, %25 : i32
    %27 = arith.minsi %c31_i32_15, %26 : i32
    %c3_i32 = arith.constant 3 : i32
    %c0_i32_16 = arith.constant 0 : i32
    %28 = tpu.memref_slice %arg5[%27, %c0_i32_16] : memref<32x128xf32, #tpu.memory_space<any>> -> memref<1x128xf32, #tpu.memory_space<any>>
    %c3_i32_17 = arith.constant 3 : i32
    %c0_i32_18 = arith.constant 0 : i32
    %29 = tpu.memref_slice %arg7[%c3_i32_17, %c0_i32_18] : memref<8x128xf32, #tpu.memory_space<vmem>> -> memref<1x128xf32, #tpu.memory_space<vmem>>
    %30 = tpu.memref_slice %arg8[%c3_i32] : memref<8x!tpu.dma_semaphore, #tpu.memory_space<semaphore_mem>> -> memref<1x!tpu.dma_semaphore, #tpu.memory_space<semaphore_mem>>
    %31 = tpu.memref_squeeze %30 : memref<1x!tpu.dma_semaphore, #tpu.memory_space<semaphore_mem>> -> memref<!tpu.dma_semaphore, #tpu.memory_space<semaphore_mem>>
    tpu.enqueue_dma source(%28 : memref<1x128xf32, #tpu.memory_space<any>>) target(%29 : memref<1x128xf32, #tpu.memory_space<vmem>>) target_semaphore(%31 : memref<!tpu.dma_semaphore, #tpu.memory_space<semaphore_mem>>)
    %32 = arith.index_cast %arg0 : i32 to index
    %c4 = arith.constant 4 : index
    %33 = memref.load %arg2[%32, %c4] : memref<2x8xi32, #tpu.memory_space<smem>>
    %c0_i32_19 = arith.constant 0 : i32
    %c31_i32_20 = arith.constant 31 : i32
    %34 = arith.maxsi %c0_i32_19, %33 : i32
    %35 = arith.minsi %c31_i32_20, %34 : i32
    %c4_i32 = arith.constant 4 : i32
    %c0_i32_21 = arith.constant 0 : i32
    %36 = tpu.memref_slice %arg5[%35, %c0_i32_21] : memref<32x128xf32, #tpu.memory_space<any>> -> memref<1x128xf32, #tpu.memory_space<any>>
    %c4_i32_22 = arith.constant 4 : i32
    %c0_i32_23 = arith.constant 0 : i32
    %37 = tpu.memref_slice %arg7[%c4_i32_22, %c0_i32_23] : memref<8x128xf32, #tpu.memory_space<vmem>> -> memref<1x128xf32, #tpu.memory_space<vmem>>
    %38 = tpu.memref_slice %arg8[%c4_i32] : memref<8x!tpu.dma_semaphore, #tpu.memory_space<semaphore_mem>> -> memref<1x!tpu.dma_semaphore, #tpu.memory_space<semaphore_mem>>
    %39 = tpu.memref_squeeze %38 : memref<1x!tpu.dma_semaphore, #tpu.memory_space<semaphore_mem>> -> memref<!tpu.dma_semaphore, #tpu.memory_space<semaphore_mem>>
    tpu.enqueue_dma source(%36 : memref<1x128xf32, #tpu.memory_space<any>>) target(%37 : memref<1x128xf32, #tpu.memory_space<vmem>>) target_semaphore(%39 : memref<!tpu.dma_semaphore, #tpu.memory_space<semaphore_mem>>)
    %40 = arith.index_cast %arg0 : i32 to index
    %c5 = arith.constant 5 : index
    %41 = memref.load %arg2[%40, %c5] : memref<2x8xi32, #tpu.memory_space<smem>>
    %c0_i32_24 = arith.constant 0 : i32
    %c31_i32_25 = arith.constant 31 : i32
    %42 = arith.maxsi %c0_i32_24, %41 : i32
    %43 = arith.minsi %c31_i32_25, %42 : i32
    %c5_i32 = arith.constant 5 : i32
    %c0_i32_26 = arith.constant 0 : i32
    %44 = tpu.memref_slice %arg5[%43, %c0_i32_26] : memref<32x128xf32, #tpu.memory_space<any>> -> memref<1x128xf32, #tpu.memory_space<any>>
    %c5_i32_27 = arith.constant 5 : i32
    %c0_i32_28 = arith.constant 0 : i32
    %45 = tpu.memref_slice %arg7[%c5_i32_27, %c0_i32_28] : memref<8x128xf32, #tpu.memory_space<vmem>> -> memref<1x128xf32, #tpu.memory_space<vmem>>
    %46 = tpu.memref_slice %arg8[%c5_i32] : memref<8x!tpu.dma_semaphore, #tpu.memory_space<semaphore_mem>> -> memref<1x!tpu.dma_semaphore, #tpu.memory_space<semaphore_mem>>
    %47 = tpu.memref_squeeze %46 : memref<1x!tpu.dma_semaphore, #tpu.memory_space<semaphore_mem>> -> memref<!tpu.dma_semaphore, #tpu.memory_space<semaphore_mem>>
    tpu.enqueue_dma source(%44 : memref<1x128xf32, #tpu.memory_space<any>>) target(%45 : memref<1x128xf32, #tpu.memory_space<vmem>>) target_semaphore(%47 : memref<!tpu.dma_semaphore, #tpu.memory_space<semaphore_mem>>)
    %48 = arith.index_cast %arg0 : i32 to index
    %c6 = arith.constant 6 : index
    %49 = memref.load %arg2[%48, %c6] : memref<2x8xi32, #tpu.memory_space<smem>>
    %c0_i32_29 = arith.constant 0 : i32
    %c31_i32_30 = arith.constant 31 : i32
    %50 = arith.maxsi %c0_i32_29, %49 : i32
    %51 = arith.minsi %c31_i32_30, %50 : i32
    %c6_i32 = arith.constant 6 : i32
    %c0_i32_31 = arith.constant 0 : i32
    %52 = tpu.memref_slice %arg5[%51, %c0_i32_31] : memref<32x128xf32, #tpu.memory_space<any>> -> memref<1x128xf32, #tpu.memory_space<any>>
    %c6_i32_32 = arith.constant 6 : i32
    %c0_i32_33 = arith.constant 0 : i32
    %53 = tpu.memref_slice %arg7[%c6_i32_32, %c0_i32_33] : memref<8x128xf32, #tpu.memory_space<vmem>> -> memref<1x128xf32, #tpu.memory_space<vmem>>
    %54 = tpu.memref_slice %arg8[%c6_i32] : memref<8x!tpu.dma_semaphore, #tpu.memory_space<semaphore_mem>> -> memref<1x!tpu.dma_semaphore, #tpu.memory_space<semaphore_mem>>
    %55 = tpu.memref_squeeze %54 : memref<1x!tpu.dma_semaphore, #tpu.memory_space<semaphore_mem>> -> memref<!tpu.dma_semaphore, #tpu.memory_space<semaphore_mem>>
    tpu.enqueue_dma source(%52 : memref<1x128xf32, #tpu.memory_space<any>>) target(%53 : memref<1x128xf32, #tpu.memory_space<vmem>>) target_semaphore(%55 : memref<!tpu.dma_semaphore, #tpu.memory_space<semaphore_mem>>)
    %56 = arith.index_cast %arg0 : i32 to index
    %c7 = arith.constant 7 : index
    %57 = memref.load %arg2[%56, %c7] : memref<2x8xi32, #tpu.memory_space<smem>>
    %c0_i32_34 = arith.constant 0 : i32
    %c31_i32_35 = arith.constant 31 : i32
    %58 = arith.maxsi %c0_i32_34, %57 : i32
    %59 = arith.minsi %c31_i32_35, %58 : i32
    %c7_i32 = arith.constant 7 : i32
    %c0_i32_36 = arith.constant 0 : i32
    %60 = tpu.memref_slice %arg5[%59, %c0_i32_36] : memref<32x128xf32, #tpu.memory_space<any>> -> memref<1x128xf32, #tpu.memory_space<any>>
    %c7_i32_37 = arith.constant 7 : i32
    %c0_i32_38 = arith.constant 0 : i32
    %61 = tpu.memref_slice %arg7[%c7_i32_37, %c0_i32_38] : memref<8x128xf32, #tpu.memory_space<vmem>> -> memref<1x128xf32, #tpu.memory_space<vmem>>
    %62 = tpu.memref_slice %arg8[%c7_i32] : memref<8x!tpu.dma_semaphore, #tpu.memory_space<semaphore_mem>> -> memref<1x!tpu.dma_semaphore, #tpu.memory_space<semaphore_mem>>
    %63 = tpu.memref_squeeze %62 : memref<1x!tpu.dma_semaphore, #tpu.memory_space<semaphore_mem>> -> memref<!tpu.dma_semaphore, #tpu.memory_space<semaphore_mem>>
    tpu.enqueue_dma source(%60 : memref<1x128xf32, #tpu.memory_space<any>>) target(%61 : memref<1x128xf32, #tpu.memory_space<vmem>>) target_semaphore(%63 : memref<!tpu.dma_semaphore, #tpu.memory_space<semaphore_mem>>)
    %c0_39 = arith.constant 0 : index
    %c0_40 = arith.constant 0 : index
    %c0_41 = arith.constant 0 : index
    %c0_42 = arith.constant 0 : index
    %64 = vector.load %arg4[%c0_39, %c0_40, %c0_41, %c0_42] : memref<1x4x16x128xf32, #tpu.memory_space<vmem>>, vector<1x1x16x128xf32>
    %65 = vector.shape_cast %64 : vector<1x1x16x128xf32> to vector<16x128xf32>
    %c0_43 = arith.constant 0 : index
    %c1_44 = arith.constant 1 : index
    %c0_45 = arith.constant 0 : index
    %c0_46 = arith.constant 0 : index
    %66 = vector.load %arg4[%c0_43, %c1_44, %c0_45, %c0_46] : memref<1x4x16x128xf32, #tpu.memory_space<vmem>>, vector<1x1x16x128xf32>
    %67 = vector.shape_cast %66 : vector<1x1x16x128xf32> to vector<16x128xf32>
    %68 = arith.addf %65, %67 : vector<16x128xf32>
    %c0_47 = arith.constant 0 : index
    %c2_48 = arith.constant 2 : index
    %c0_49 = arith.constant 0 : index
    %c0_50 = arith.constant 0 : index
    %69 = vector.load %arg4[%c0_47, %c2_48, %c0_49, %c0_50] : memref<1x4x16x128xf32, #tpu.memory_space<vmem>>, vector<1x1x16x128xf32>
    %70 = vector.shape_cast %69 : vector<1x1x16x128xf32> to vector<16x128xf32>
    %71 = arith.addf %68, %70 : vector<16x128xf32>
    %c0_51 = arith.constant 0 : index
    %c3_52 = arith.constant 3 : index
    %c0_53 = arith.constant 0 : index
    %c0_54 = arith.constant 0 : index
    %72 = vector.load %arg4[%c0_51, %c3_52, %c0_53, %c0_54] : memref<1x4x16x128xf32, #tpu.memory_space<vmem>>, vector<1x1x16x128xf32>
    %73 = vector.shape_cast %72 : vector<1x1x16x128xf32> to vector<16x128xf32>
    %74 = arith.addf %71, %73 : vector<16x128xf32>
    %75 = arith.index_cast %arg0 : i32 to index
    %76 = memref.load %arg1[%75] : memref<2xi32, #tpu.memory_space<smem>>
    %77 = tpu.iota {dimensions = array<i32: 0>} : vector<8x1xi32>
    %78 = vector.broadcast %76 : i32 to vector<8x1xi32>
    %79 = arith.cmpi slt, %77, %78 : vector<8x1xi32>
    %80 = arith.extui %79 : vector<8x1xi1> to vector<8x1xi32>
    %81 = arith.sitofp %80 : vector<8x1xi32> to vector<8x1xf32>
    %82 = tpu.iota {dimensions = array<i32: 0>} : vector<8x16xi32>
    %c0_55 = arith.constant 0 : index
    %c0_56 = arith.constant 0 : index
    %c0_57 = arith.constant 0 : index
    %83 = vector.load %arg3[%c0_55, %c0_56, %c0_57] : memref<1x2x16xi32, #tpu.memory_space<vmem>>, vector<1x2x16xi32>
    %84 = vector.shape_cast %83 : vector<1x2x16xi32> to vector<2x16xi32>
    %85 = vector.extract_strided_slice %84 {offsets = [0, 0], sizes = [1, 16], strides = [1, 1]} : vector<2x16xi32> to vector<1x16xi32>
    %86 = arith.sitofp %85 : vector<1x16xi32> to vector<1x16xf32>
    %87 = vector.extract_strided_slice %84 {offsets = [1, 0], sizes = [1, 16], strides = [1, 1]} : vector<2x16xi32> to vector<1x16xi32>
    %88 = vector.broadcast %87 : vector<1x16xi32> to vector<8x16xi32>
    %89 = arith.cmpi eq, %88, %82 : vector<8x16xi32>
    %90 = arith.extui %89 : vector<8x16xi1> to vector<8x16xi32>
    %91 = arith.sitofp %90 : vector<8x16xi32> to vector<8x16xf32>
    %92 = vector.broadcast %86 : vector<1x16xf32> to vector<8x16xf32>
    %93 = arith.mulf %91, %92 : vector<8x16xf32>
    %94 = vector.broadcast %81 : vector<8x1xf32> to vector<8x16xf32>
    %95 = arith.mulf %93, %94 : vector<8x16xf32>
    %cst = arith.constant 2.500000e-01 : f32
    %96 = vector.broadcast %cst : f32 to vector<8x16xf32>
    %97 = arith.mulf %95, %96 : vector<8x16xf32>
    %cst_58 = arith.constant dense<0.000000e+00> : vector<8x128xf32>
    %98 = tpu.matmul %97, %74, %cst_58 {dimension_numbers = #tpu.dot_dimension_numbers<[1], [0], [0], [1], [0, 0, 1, 1], [], []>} : vector<8x16xf32>, vector<16x128xf32>, vector<8x128xf32> -> vector<8x128xf32>
    %c0_59 = arith.constant 0 : index
    %c128 = arith.constant 128 : index
    %99 = vector.load %arg6[%c0_59, %c128] : memref<8x256xf32, #tpu.memory_space<vmem>>, vector<8x128xf32>
    tpu.vector_store %arg6[%c0_59, %c128], %98 {strides = array<i32>} : memref<8x256xf32, #tpu.memory_space<vmem>>, vector<8x128xf32>,
    %c0_i32_60 = arith.constant 0 : i32
    %c0_i32_61 = arith.constant 0 : i32
    %c0_i32_62 = arith.constant 0 : i32
    %100 = tpu.memref_slice %arg5[%c0_i32_61, %c0_i32_62] : memref<32x128xf32, #tpu.memory_space<any>> -> memref<1x128xf32, #tpu.memory_space<any>>
    %c0_i32_63 = arith.constant 0 : i32
    %c0_i32_64 = arith.constant 0 : i32
    %101 = tpu.memref_slice %arg7[%c0_i32_63, %c0_i32_64] : memref<8x128xf32, #tpu.memory_space<vmem>> -> memref<1x128xf32, #tpu.memory_space<vmem>>
    %102 = tpu.memref_slice %arg8[%c0_i32_60] : memref<8x!tpu.dma_semaphore, #tpu.memory_space<semaphore_mem>> -> memref<1x!tpu.dma_semaphore, #tpu.memory_space<semaphore_mem>>
    %103 = tpu.memref_squeeze %102 : memref<1x!tpu.dma_semaphore, #tpu.memory_space<semaphore_mem>> -> memref<!tpu.dma_semaphore, #tpu.memory_space<semaphore_mem>>
    tpu.wait_dma2 semaphore(%103 : memref<!tpu.dma_semaphore, #tpu.memory_space<semaphore_mem>>) src(%100 : memref<1x128xf32, #tpu.memory_space<any>>) dst(%101 : memref<1x128xf32, #tpu.memory_space<vmem>>)
    %c1_i32_65 = arith.constant 1 : i32
    %c0_i32_66 = arith.constant 0 : i32
    %c0_i32_67 = arith.constant 0 : i32
    %104 = tpu.memref_slice %arg5[%c0_i32_66, %c0_i32_67] : memref<32x128xf32, #tpu.memory_space<any>> -> memref<1x128xf32, #tpu.memory_space<any>>
    %c1_i32_68 = arith.constant 1 : i32
    %c0_i32_69 = arith.constant 0 : i32
    %105 = tpu.memref_slice %arg7[%c1_i32_68, %c0_i32_69] : memref<8x128xf32, #tpu.memory_space<vmem>> -> memref<1x128xf32, #tpu.memory_space<vmem>>
    %106 = tpu.memref_slice %arg8[%c1_i32_65] : memref<8x!tpu.dma_semaphore, #tpu.memory_space<semaphore_mem>> -> memref<1x!tpu.dma_semaphore, #tpu.memory_space<semaphore_mem>>
    %107 = tpu.memref_squeeze %106 : memref<1x!tpu.dma_semaphore, #tpu.memory_space<semaphore_mem>> -> memref<!tpu.dma_semaphore, #tpu.memory_space<semaphore_mem>>
    tpu.wait_dma2 semaphore(%107 : memref<!tpu.dma_semaphore, #tpu.memory_space<semaphore_mem>>) src(%104 : memref<1x128xf32, #tpu.memory_space<any>>) dst(%105 : memref<1x128xf32, #tpu.memory_space<vmem>>)
    %c2_i32_70 = arith.constant 2 : i32
    %c0_i32_71 = arith.constant 0 : i32
    %c0_i32_72 = arith.constant 0 : i32
    %108 = tpu.memref_slice %arg5[%c0_i32_71, %c0_i32_72] : memref<32x128xf32, #tpu.memory_space<any>> -> memref<1x128xf32, #tpu.memory_space<any>>
    %c2_i32_73 = arith.constant 2 : i32
    %c0_i32_74 = arith.constant 0 : i32
    %109 = tpu.memref_slice %arg7[%c2_i32_73, %c0_i32_74] : memref<8x128xf32, #tpu.memory_space<vmem>> -> memref<1x128xf32, #tpu.memory_space<vmem>>
    %110 = tpu.memref_slice %arg8[%c2_i32_70] : memref<8x!tpu.dma_semaphore, #tpu.memory_space<semaphore_mem>> -> memref<1x!tpu.dma_semaphore, #tpu.memory_space<semaphore_mem>>
    %111 = tpu.memref_squeeze %110 : memref<1x!tpu.dma_semaphore, #tpu.memory_space<semaphore_mem>> -> memref<!tpu.dma_semaphore, #tpu.memory_space<semaphore_mem>>
    tpu.wait_dma2 semaphore(%111 : memref<!tpu.dma_semaphore, #tpu.memory_space<semaphore_mem>>) src(%108 : memref<1x128xf32, #tpu.memory_space<any>>) dst(%109 : memref<1x128xf32, #tpu.memory_space<vmem>>)
    %c3_i32_75 = arith.constant 3 : i32
    %c0_i32_76 = arith.constant 0 : i32
    %c0_i32_77 = arith.constant 0 : i32
    %112 = tpu.memref_slice %arg5[%c0_i32_76, %c0_i32_77] : memref<32x128xf32, #tpu.memory_space<any>> -> memref<1x128xf32, #tpu.memory_space<any>>
    %c3_i32_78 = arith.constant 3 : i32
    %c0_i32_79 = arith.constant 0 : i32
    %113 = tpu.memref_slice %arg7[%c3_i32_78, %c0_i32_79] : memref<8x128xf32, #tpu.memory_space<vmem>> -> memref<1x128xf32, #tpu.memory_space<vmem>>
    %114 = tpu.memref_slice %arg8[%c3_i32_75] : memref<8x!tpu.dma_semaphore, #tpu.memory_space<semaphore_mem>> -> memref<1x!tpu.dma_semaphore, #tpu.memory_space<semaphore_mem>>
    %115 = tpu.memref_squeeze %114 : memref<1x!tpu.dma_semaphore, #tpu.memory_space<semaphore_mem>> -> memref<!tpu.dma_semaphore, #tpu.memory_space<semaphore_mem>>
    tpu.wait_dma2 semaphore(%115 : memref<!tpu.dma_semaphore, #tpu.memory_space<semaphore_mem>>) src(%112 : memref<1x128xf32, #tpu.memory_space<any>>) dst(%113 : memref<1x128xf32, #tpu.memory_space<vmem>>)
    %c4_i32_80 = arith.constant 4 : i32
    %c0_i32_81 = arith.constant 0 : i32
    %c0_i32_82 = arith.constant 0 : i32
    %116 = tpu.memref_slice %arg5[%c0_i32_81, %c0_i32_82] : memref<32x128xf32, #tpu.memory_space<any>> -> memref<1x128xf32, #tpu.memory_space<any>>
    %c4_i32_83 = arith.constant 4 : i32
    %c0_i32_84 = arith.constant 0 : i32
    %117 = tpu.memref_slice %arg7[%c4_i32_83, %c0_i32_84] : memref<8x128xf32, #tpu.memory_space<vmem>> -> memref<1x128xf32, #tpu.memory_space<vmem>>
    %118 = tpu.memref_slice %arg8[%c4_i32_80] : memref<8x!tpu.dma_semaphore, #tpu.memory_space<semaphore_mem>> -> memref<1x!tpu.dma_semaphore, #tpu.memory_space<semaphore_mem>>
    %119 = tpu.memref_squeeze %118 : memref<1x!tpu.dma_semaphore, #tpu.memory_space<semaphore_mem>> -> memref<!tpu.dma_semaphore, #tpu.memory_space<semaphore_mem>>
    tpu.wait_dma2 semaphore(%119 : memref<!tpu.dma_semaphore, #tpu.memory_space<semaphore_mem>>) src(%116 : memref<1x128xf32, #tpu.memory_space<any>>) dst(%117 : memref<1x128xf32, #tpu.memory_space<vmem>>)
    %c5_i32_85 = arith.constant 5 : i32
    %c0_i32_86 = arith.constant 0 : i32
    %c0_i32_87 = arith.constant 0 : i32
    %120 = tpu.memref_slice %arg5[%c0_i32_86, %c0_i32_87] : memref<32x128xf32, #tpu.memory_space<any>> -> memref<1x128xf32, #tpu.memory_space<any>>
    %c5_i32_88 = arith.constant 5 : i32
    %c0_i32_89 = arith.constant 0 : i32
    %121 = tpu.memref_slice %arg7[%c5_i32_88, %c0_i32_89] : memref<8x128xf32, #tpu.memory_space<vmem>> -> memref<1x128xf32, #tpu.memory_space<vmem>>
    %122 = tpu.memref_slice %arg8[%c5_i32_85] : memref<8x!tpu.dma_semaphore, #tpu.memory_space<semaphore_mem>> -> memref<1x!tpu.dma_semaphore, #tpu.memory_space<semaphore_mem>>
    %123 = tpu.memref_squeeze %122 : memref<1x!tpu.dma_semaphore, #tpu.memory_space<semaphore_mem>> -> memref<!tpu.dma_semaphore, #tpu.memory_space<semaphore_mem>>
    tpu.wait_dma2 semaphore(%123 : memref<!tpu.dma_semaphore, #tpu.memory_space<semaphore_mem>>) src(%120 : memref<1x128xf32, #tpu.memory_space<any>>) dst(%121 : memref<1x128xf32, #tpu.memory_space<vmem>>)
    %c6_i32_90 = arith.constant 6 : i32
    %c0_i32_91 = arith.constant 0 : i32
    %c0_i32_92 = arith.constant 0 : i32
    %124 = tpu.memref_slice %arg5[%c0_i32_91, %c0_i32_92] : memref<32x128xf32, #tpu.memory_space<any>> -> memref<1x128xf32, #tpu.memory_space<any>>
    %c6_i32_93 = arith.constant 6 : i32
    %c0_i32_94 = arith.constant 0 : i32
    %125 = tpu.memref_slice %arg7[%c6_i32_93, %c0_i32_94] : memref<8x128xf32, #tpu.memory_space<vmem>> -> memref<1x128xf32, #tpu.memory_space<vmem>>
    %126 = tpu.memref_slice %arg8[%c6_i32_90] : memref<8x!tpu.dma_semaphore, #tpu.memory_space<semaphore_mem>> -> memref<1x!tpu.dma_semaphore, #tpu.memory_space<semaphore_mem>>
    %127 = tpu.memref_squeeze %126 : memref<1x!tpu.dma_semaphore, #tpu.memory_space<semaphore_mem>> -> memref<!tpu.dma_semaphore, #tpu.memory_space<semaphore_mem>>
    tpu.wait_dma2 semaphore(%127 : memref<!tpu.dma_semaphore, #tpu.memory_space<semaphore_mem>>) src(%124 : memref<1x128xf32, #tpu.memory_space<any>>) dst(%125 : memref<1x128xf32, #tpu.memory_space<vmem>>)
    %c7_i32_95 = arith.constant 7 : i32
    %c0_i32_96 = arith.constant 0 : i32
    %c0_i32_97 = arith.constant 0 : i32
    %128 = tpu.memref_slice %arg5[%c0_i32_96, %c0_i32_97] : memref<32x128xf32, #tpu.memory_space<any>> -> memref<1x128xf32, #tpu.memory_space<any>>
    %c7_i32_98 = arith.constant 7 : i32
    %c0_i32_99 = arith.constant 0 : i32
    %129 = tpu.memref_slice %arg7[%c7_i32_98, %c0_i32_99] : memref<8x128xf32, #tpu.memory_space<vmem>> -> memref<1x128xf32, #tpu.memory_space<vmem>>
    %130 = tpu.memref_slice %arg8[%c7_i32_95] : memref<8x!tpu.dma_semaphore, #tpu.memory_space<semaphore_mem>> -> memref<1x!tpu.dma_semaphore, #tpu.memory_space<semaphore_mem>>
    %131 = tpu.memref_squeeze %130 : memref<1x!tpu.dma_semaphore, #tpu.memory_space<semaphore_mem>> -> memref<!tpu.dma_semaphore, #tpu.memory_space<semaphore_mem>>
    tpu.wait_dma2 semaphore(%131 : memref<!tpu.dma_semaphore, #tpu.memory_space<semaphore_mem>>) src(%128 : memref<1x128xf32, #tpu.memory_space<any>>) dst(%129 : memref<1x128xf32, #tpu.memory_space<vmem>>)
    %c0_100 = arith.constant 0 : index
    %c0_101 = arith.constant 0 : index
    %132 = vector.load %arg7[%c0_100, %c0_101] : memref<8x128xf32, #tpu.memory_space<vmem>>, vector<8x128xf32>
    %133 = vector.broadcast %81 : vector<8x1xf32> to vector<8x128xf32>
    %134 = arith.mulf %132, %133 : vector<8x128xf32>
    %c0_102 = arith.constant 0 : index
    %c0_103 = arith.constant 0 : index
    %135 = vector.load %arg6[%c0_102, %c0_103] : memref<8x256xf32, #tpu.memory_space<vmem>>, vector<8x128xf32>
    tpu.vector_store %arg6[%c0_102, %c0_103], %134 {strides = array<i32>} : memref<8x256xf32, #tpu.memory_space<vmem>>, vector<8x128xf32>,
    return
  }
  func.func @transform_0(%arg0: i32, %arg1: memref<2xi32, #tpu.memory_space<smem>>, %arg2: memref<2x8xi32, #tpu.memory_space<smem>>) -> (i32, i32, i32) {
    %c0_i32 = arith.constant 0 : i32
    %c0_i32_0 = arith.constant 0 : i32
    %c0_i32_1 = arith.constant 0 : i32
    return %arg0, %c0_i32, %c0_i32_0 : i32, i32, i32
  }
  func.func @transform_1(%arg0: i32, %arg1: memref<2xi32, #tpu.memory_space<smem>>, %arg2: memref<2x8xi32, #tpu.memory_space<smem>>) -> (i32, i32, i32, i32) {
    %c0_i32 = arith.constant 0 : i32
    %c0_i32_0 = arith.constant 0 : i32
    %c0_i32_1 = arith.constant 0 : i32
    %c0_i32_2 = arith.constant 0 : i32
    return %arg0, %c0_i32, %c0_i32_0, %c0_i32_1 : i32, i32, i32, i32
  }
  func.func @transform_3(%arg0: i32, %arg1: memref<2xi32, #tpu.memory_space<smem>>, %arg2: memref<2x8xi32, #tpu.memory_space<smem>>) -> (i32, i32) {
    %c0_i32 = arith.constant 0 : i32
    %c0_i32_0 = arith.constant 0 : i32
    return %c0_i32, %arg0 : i32, i32
  }
}

</mosaic_0001>

<bundles_post_ra>
// kernel: udpipe2_preprocess.1
= control target key start
LH: loop header
LB: loop body
LE: loop exit
PB: predicated region body
PF: predicated region fallthrough
CT: control target
= control target key end

     0   :  { %s1446_s0 = inlined_call_operand.vmem [shape: s32[2], index: 0, kind: input, shape index: {}]   ;;  %s1447_s2 = inlined_call_operand.vmem [shape: s32[2,2,16], index: 2, kind: input, shape index: {}]   ;;  %s1448_s3 = inlined_call_operand.hbm [shape: f32[2,4,16,128], index: 3, kind: input, shape index: {}]   ;;  %s1449_s4 = inlined_call_operand.vmem [shape: f32[32,128], index: 4, kind: input, shape index: {}]   ;;  %s1450_s5 = inlined_call_operand.vmem [shape: f32[8,512], index: 5, kind: output, shape index: {}]   ;;  %s1451_s1 = inlined_call_operand.vmem [shape: s32[2,8], index: 1, kind: input, shape index: {}]  }
   0x1   :  { %s10_s20 = sshll.u32 %s1446_s0, 4  ;;  %s14_s23 = sshll.u32 %s1451_s1, 4  ;;  %s11_s20 = int_to_ptr.vmem [resolvable:$true] %s10_s20  ;;  %s15_s23 = int_to_ptr.vmem [resolvable:$true] %s14_s23 }
   0x2   :  { %s1129_s24 = scalar_lea.vmem %s11_s20, 16  ;;  %p1134_p1 = scmp.lt.s32.totalorder %s11_s20, %s11_s20 }
   0x3   :  { %p1130_p0 = scmp.ne.s32.totalorder %s11_s20, %s1129_s24  ;;  %p1135_p2 = scmp.lt.s32.totalorder %s1129_s24, %s1129_s24 }
   0x5   :  { %p1136_p3 = por %p1135_p2, %p1134_p1 }
   0x7   :  { %p1137_p4 = pnand %p1136_p3, %p1130_p0 }
   0x9   :  { %1140 = shalt.err (!%p1137_p4)  }
   0xa   :  { %s1237_s25 = smov [#allocation5]   ;;  %s1141_s26 = scalar_lea.vmem %s15_s23, 32 }
   0xb   :  { %13 = dma.vmem_to_smem %s11_s20, 16, %s1237_s25, [#allocation4] }
   0xc   :  { %p1142_p5 = scmp.ne.s32.totalorder %s15_s23, %s1141_s26  ;;  %p1146_p6 = scmp.lt.s32.totalorder %s15_s23, %s15_s23 }
   0xd   :  { %p1147_p7 = scmp.lt.s32.totalorder %s1141_s26, %s1141_s26 }
   0xf   :  { %p1148_p8 = por %p1147_p7, %p1146_p6 }
  0x11   :  { %p1149_p9 = pnand %p1148_p8, %p1142_p5 }
  0x13   :  { %1152 = shalt.err (!%p1149_p9)  }
  0x14   :  { %s1238_s0 = smov [#allocation6]  }
  0x15   :  { %17 = dma.vmem_to_smem %s15_s23, 32, %s1238_s0, [#allocation4] }
  0x16   :  { %1199 = dma.done.wait [#allocation4], 48 }
  0x17   :  { %1200 = vsyncadd [#allocation4], 4294967248 }
  0x18   :  { %19 = sfence }
  0x19   :  { %20 = vsyncpa [#allocation8], 0 }
  0x1a   :  { %22 = vsyncpa [#allocation8 + $0x1], 0  ;;  %s1281_s1 = smov 0   ;;  %s1283_s27 = smov 0  }
  0x1b   :  { %s1285_s28 = smov 0   ;;  %s1287_s29 = smov 0  }
  0x1c LB: > { %s1300_s30 = sadd.s32 4294967295, %s1235_s29   ;;  %s1303_s6 = sadd.s32 1, %s1235_s29   ;;  %s1235_s29 = sphi %s1287_s29, %s1458_s29   ;;  %s1231_s28 = sphi %s1285_s28, %s1457_s28   ;;  %s1227_s27 = sphi %s1283_s27, %s1456_s27   ;;  %s1223_s1 = sphi %s1281_s1, %s1455_s1  }
  0x1d   : > { %s58_s7 = ssub.s32 %s1235_s29, %s1303_s6  ;;  %s61_s8 = sadd.s32 1, %s1231_s28 }
  0x1e   : > { %p59_p10 = scmp.eq.s32.totalorder %s58_s7, 0  ;;  %p68_p11 = scmp.ne.s32.totalorder %s1231_s28, %s1227_s27 }
  0x1f   : > { %p69_p12 = scmp.eq.s32.totalorder %s1235_s29, 0  ;;  %p74_p13 = scmp.ne.s32.totalorder %s1227_s27, %s1223_s1 }
  0x20   : > { %s1313_s9 = scalar_select %p59_p10, %s1231_s28, %s61_s8  }
  0x21   : > { %p70_p0 = por %p69_p12, %p68_p11  ;;  %p75_p1 = scmp.eq.s32.totalorder %s1300_s30, 0 }
  0x22   : > { %p1089_p2 = scmp.lt.s32.totalorder %s1235_s29, 2  ;;  %s131_s11 = sand.u32 1, %s1231_s28  }
  0x23   : > { %p1317_p3 = por %p75_p1, %p74_p13  ;;  %s985_s12 = sshll.u32 %s131_s11, 6 }
  0x24   : > { %s1053_s13 = sshll.u32 %s1235_s29, 10  ;;  %s135_s17 = scalar_lea.vmem [#allocation7], %s985_s12 }
  0x25   : > { %s1326_s16 = scalar_lea.hbm %s1448_s3, %s1053_s13  ;;  %s142_s18 = sshll.u32 %s135_s17, 4  ;;  %s1328_s18 = int_to_ptr.vmem [resolvable:$true] %s142_s18 }
  0x26   : > { %p1330_p4 = pnand %p1089_p2, %p70_p0  ;;  %s1335_s20 = scalar_lea.sflag [#allocation8], %s131_s11 }
  0x27   : > { %s1153_s21 = scalar_lea.hbm %s1326_s16, 1024  ;;  %s1158_s24 = scalar_lea.hbm %s1448_s3, 2048 }
  0x28   : > { %p1154_p6 = scmp.ne.s32.totalorder %s1326_s16, %s1153_s21  ;;  %p1155_p7 = pneg %p1330_p4 }
  0x29   : > { %p1159_p10 = scmp.lt.u32.totalorder %s1326_s16, %s1448_s3  ;;  %p1160_p11 = scmp.lt.u32.totalorder %s1158_s24, %s1153_s21 }
  0x2a   : > { %p1156_p8 = pnand %p1155_p7, %p1154_p6  ;;  %p1162_p13 = scmp.lt.u32.totalorder %s1153_s21, %s1326_s16 }
  0x2b   : > { %p1161_p12 = por %p1160_p11, %p1159_p10 }
  0x2c   : > { %p1157_p9 = pneg %p1156_p8 }
  0x2d   : > { %p1163_p0 = por %p1162_p13, %p1161_p12 }
  0x2f   : > { %p1164_p1 = pnand %p1163_p0, %p1157_p9 }
  0x31   : > { %1167 = shalt.err (!%p1164_p1)
}
  0x32   : > { %s1168_s0 = scalar_lea.vmem %s1328_s18, 1024  ;;  %s1239_s1 = smov [#allocation7]  }
  0x33   : > { %p1169_p2 = scmp.ne.s32.totalorder %s1328_s18, %s1168_s0  ;;  %s1173_s7 = sshll.u32 %s1239_s1, 4  ;;  %s1174_s7 = int_to_ptr.vmem [resolvable:$false] %s1173_s7 }
  0x34   : > { %s1175_s8 = scalar_lea.vmem %s1174_s7, 2048  ;;  %p1176_p5 = scmp.lt.s32.totalorder %s1328_s18, %s1174_s7 }
  0x35   : > { %p1171_p6 = pnand %p1169_p2, %p1155_p7  ;;  %p1177_p10 = scmp.lt.s32.totalorder %s1175_s8, %s1168_s0 }
  0x37   : > { %p1172_p8 = pneg %p1171_p6  ;;  %p1178_p11 = por %p1177_p10, %p1176_p5 }
  0x39   : > { %p1179_p12 = pnand %p1178_p11, %p1172_p8 }
  0x3b   : > { %1182 = shalt.err (!%p1179_p12)
}
  0x3c   : > { %s1240_s11 = smov 128   ;;  %s1241_s12 = smov 8  }
  0x3d   : > { %1088 = dma.hbm_to_vmem [thread:$0]  (!%p1330_p4), %s1326_s16, 1024, %s1328_s18, %s1335_s20, %s1240_s11, %s1240_s11, %s1241_s12  }
  0x3e   : > { %p150_p7 = scmp.lt.s32.totalorder %s1235_s29, 3  ;;  %p1454_p9 = scmp.ge.s32.totalorder %s1235_s29, 1 }
  0x40   : > { %p151_p13 = pnand %p1454_p9, %p150_p7 }
  0x41   : > { %s156_s13 = sand.u32 (!%p151_p13), 1, %s1227_s27  }
  0x42   : > { %154 = sbr.rel (%p151_p13) target bundleno = 434 (0x1b2), region = 28  ;;  %s989_s14 = sshll.u32 (!%p151_p13), %s156_s13, 6 }
  0x43   : > { %s157_s15 = scalar_lea.sflag (!%p151_p13), [#allocation8], %s156_s13  ;;  %s1367_s17 = scalar_lea.vmem (!%p151_p13), [#allocation7], %s989_s14 }
  0x49   : > { %1202 = dma.done.wait (%p1317_p3), %s157_s15, 1024  }
  0x4a   : > { %1204 = vsyncadd (%p1317_p3), %s157_s15, 4294966272  ;;  %s1374_s16 = sshll.u32 %s1300_s30, 7  ;;  %p185_p4 = scmp.lt.s32.totalorder %s1300_s30, 1 }
  0x4b   : > { %s196_s29 = sld [smem:[#allocation6 + %s1374_s16]]  ;;  %s991_s18 = sshll.u32 %s1300_s30, 1 }
  0x4c   : > { %s186_s19 = scalar_select %p185_p4, %s1300_s30, 1 }
  0x4d   : > { %p190_p5 = scmp.lt.s32.totalorder %s991_s18, 3 }
  0x4e   : > { %s990_s20 = sshll.u32 %s186_s19, 1 }
  0x4f   : > { %s1383_s23 = scalar_lea.vmem %s1447_s2, %s990_s20  ;;  %s1460_s18 = smov (!%p190_p5, %s991_s18), 3 }
  0x50   : > { %s992_s10 = sshll.u32 %s1460_s18, 3 }
  0x51   : > { %p197_p3 = scmp.gt.s32.totalorder %s196_s29, 0  ;;  %p994_p0 = scmp.lt.s32.totalorder %s196_s29, 31 }
  0x52   : > { %s1388_s26 = scalar_lea.vmem %s1450_s5, %s992_s10 }
  0x53   : > { %s1462_s29 = smov (!%p197_p3, %s196_s29), 0 }
  0x54   : > { %s1464_s29 = smov (!%p994_p0, %s1462_s29), 31 }
  0x55   : > { %s201_s7 = scalar_lea.vmem %s1449_s4, %s1464_s29 }
  0x56   : > { %v219_v0 = vld [vmem:[%s201_s7] sm:$0x1] }
  0x57   : > { %220 = vst [vmem:[#allocation2] sm:$0x1] %v219_v0 }
  0x58   : > { %245 = vsyncadd [#allocation3], 16  ;;  %s246_s8 = sadd.s32 1, %s1374_s16 }
  0x59   : > { %s247_s11 = sld [smem:[#allocation6 + %s246_s8]] }
  0x5f   : > { %p248_p1 = scmp.gt.s32.totalorder %s247_s11, 0  ;;  %p999_p2 = scmp.lt.s32.totalorder %s247_s11, 31 }
  0x61   : > { %s1466_s11 = smov (!%p248_p1, %s247_s11), 0 }
  0x62   : > { %s1468_s11 = smov (!%p999_p2, %s1466_s11), 31 }
  0x63   : > { %s252_s14 = scalar_lea.vmem %s1449_s4, %s1468_s11 }
  0x64   : > { %v272_v1 = vld [vmem:[%s252_s14] sm:$0x1] }
  0x65   : > { %273 = vst [vmem:[#allocation2 + $0x1] sm:$0x1] %v272_v1 }
  0x66   : > { %298 = vsyncadd [#allocation3 + $0x1], 16  ;;  %s299_s15 = sadd.s32 2, %s1374_s16 }
  0x67   : > { %s300_s29 = sld [smem:[#allocation6 + %s299_s15]] }
  0x6d   : > { %p301_p6 = scmp.gt.s32.totalorder %s300_s29, 0  ;;  %p1004_p8 = scmp.lt.s32.totalorder %s300_s29, 31 }
  0x6f   : > { %s1470_s29 = smov (!%p301_p6, %s300_s29), 0 }
  0x70   : > { %s1472_s29 = smov (!%p1004_p8, %s1470_s29), 31 }
  0x71   : > { %s305_s20 = scalar_lea.vmem %s1449_s4, %s1472_s29 }
  0x72   : > { %v325_v2 = vld [vmem:[%s305_s20] sm:$0x1] }
  0x73   : > { %326 = vst [vmem:[#allocation2 + $0x2] sm:$0x1] %v325_v2 }
  0x74   : > { %351 = vsyncadd [#allocation3 + $0x2], 16  ;;  %s352_s21 = sadd.s32 3, %s1374_s16 }
  0x75   : > { %s353_s22 = sld [smem:[#allocation6 + %s352_s21]] }
  0x7b   : > { %p354_p10 = scmp.gt.s32.totalorder %s353_s22, 0  ;;  %p1009_p11 = scmp.lt.s32.totalorder %s353_s22, 31 }
  0x7d   : > { %s1474_s22 = smov (!%p354_p10, %s353_s22), 0 }
  0x7e   : > { %s1476_s22 = smov (!%p1009_p11, %s1474_s22), 31 }
  0x7f   : > { %s358_s25 = scalar_lea.vmem %s1449_s4, %s1476_s22 }
  0x80   : > { %v378_v3 = vld [vmem:[%s358_s25] sm:$0x1] }
  0x81   : > { %379 = vst [vmem:[#allocation2 + $0x3] sm:$0x1] %v378_v3 }
  0x82   : > { %404 = vsyncadd [#allocation3 + $0x3], 16  ;;  %s405_s0 = sadd.s32 4, %s1374_s16 }
  0x83   : > { %s406_s1 = sld [smem:[#allocation6 + %s405_s0]] }
  0x89   : > { %p407_p12 = scmp.gt.s32.totalorder %s406_s1, 0  ;;  %p1014_p7 = scmp.lt.s32.totalorder %s406_s1, 31 }
  0x8b   : > { %s1478_s1 = smov (!%p407_p12, %s406_s1), 0 }
  0x8c   : > { %s1480_s1 = smov (!%p1014_p7, %s1478_s1), 31 }
  0x8d   : > { %s411_s11 = scalar_lea.vmem %s1449_s4, %s1480_s1 }
  0x8e   : > { %v431_v4 = vld [vmem:[%s411_s11] sm:$0x1] }
  0x8f   : > { %432 = vst [vmem:[#allocation2 + $0x4] sm:$0x1] %v431_v4 }
  0x90   : > { %457 = vsyncadd [#allocation3 + $0x4], 16  ;;  %s458_s12 = sadd.s32 5, %s1374_s16 }
  0x91   : > { %s459_s13 = sld [smem:[#allocation6 + %s458_s12]] }
  0x97   : > { %p460_p9 = scmp.gt.s32.totalorder %s459_s13, 0  ;;  %p1019_p13 = scmp.lt.s32.totalorder %s459_s13, 31 }
  0x99   : > { %s1482_s13 = smov (!%p460_p9, %s459_s13), 0 }
  0x9a   : > { %s1484_s13 = smov (!%p1019_p13, %s1482_s13), 31 }
  0x9b   : > { %s464_s29 = scalar_lea.vmem %s1449_s4, %s1484_s13 }
  0x9c   : > { %v484_v5 = vld [vmem:[%s464_s29] sm:$0x1] }
  0x9d   : > { %485 = vst [vmem:[#allocation2 + $0x5] sm:$0x1] %v484_v5 }
  0x9e   : > { %510 = vsyncadd [#allocation3 + $0x5], 16  ;;  %s511_s18 = sadd.s32 6, %s1374_s16 }
  0x9f   : > { %s512_s19 = sld [smem:[#allocation6 + %s511_s18]] }
  0xa5   : > { %p513_p4 = scmp.gt.s32.totalorder %s512_s19, 0  ;;  %p1024_p5 = scmp.lt.s32.totalorder %s512_s19, 31 }
  0xa7   : > { %s1486_s19 = smov (!%p513_p4, %s512_s19), 0 }
  0xa8   : > { %s1488_s19 = smov (!%p1024_p5, %s1486_s19), 31 }
  0xa9   : > { %s517_s22 = scalar_lea.vmem %s1449_s4, %s1488_s19 }
  0xaa   : > { %v537_v6 = vld [vmem:[%s517_s22] sm:$0x1] }
  0xab   : > { %538 = vst [vmem:[#allocation2 + $0x6] sm:$0x1] %v537_v6 }
  0xac   : > { %563 = vsyncadd [#allocation3 + $0x6], 16  ;;  %s564_s10 = sadd.s32 7, %s1374_s16 }
  0xad   : > { %s565_s24 = sld [smem:[#allocation6 + %s564_s10]] }
  0xb3   : > { %p566_p3 = scmp.gt.s32.totalorder %s565_s24, 0  ;;  %p1029_p0 = scmp.lt.s32.totalorder %s565_s24, 31 }
  0xb5   : > { %s1490_s24 = smov (!%p566_p3, %s565_s24), 0 }
  0xb6   : > { %s1492_s24 = smov (!%p1029_p0, %s1490_s24), 31 }
  0xb7   : > { %s570_s1 = scalar_lea.vmem %s1449_s4, %s1492_s24 }
  0xb8   : > { %v590_v7 = vld [vmem:[%s570_s1] sm:$0x1] }
  0xb9   : > { %591 = vst [vmem:[#allocation2 + $0x7] sm:$0x1] %v590_v7 }
  0xba   : > { %616 = vsyncadd [#allocation3 + $0x7], 16  ;;  %v617_v8 = vld [vmem:[%s1367_s17] sm:$0xff]  ;;  %v618_v9 = vld [vmem:[%s1367_s17 + $0x8] sm:$0xff]  ;;  %s634_s16 = sld [smem:[#allocation5 + %s1300_s30]]  ;;  %v635_v10 = vlaneseq  ;;  %v1242_v11 = vmov 0.0|0.0  }
  0xbb   : > { %1080 = vmatprep.subr.bf16.mxu0 %v1242_v11  ;;  %v1034_v12 = vld [vmem:[%s1367_s17 + $0x10] sm:$0xff]  ;;  %v1035_v13 = vld [vmem:[%s1367_s17 + $0x18] sm:$0xff]  ;;  %v1036_v14 = vld [vmem:[%s1367_s17 + $0x20] sm:$0xff]  ;;  %vm1243_vm0 = vmmov 0   ;;  %v1244_v19 = vmov 0.0   ;;  %vm657_vm3 = vcmask 130048  }
  0xbc   : > { %v622_v15 = vadd.f32 %v1034_v12, %v617_v8  ;;  %v623_v16 = vadd.f32 %v1035_v13, %v618_v9  ;;  %v1037_v17 = vld [vmem:[%s1367_s17 + $0x28] sm:$0xff]  ;;  %v636_v18 = vshrl.u32 %v635_v10, 7  ;;  %1077 = vmatprep.mubr.msk.f32.mxu0 %vm1243_vm0, %v1244_v19  ;;  %v1038_v20 = vld [vmem:[%s1367_s17 + $0x30] sm:$0xff]  ;;  %v1039_v21 = vld [vmem:[%s1367_s17 + $0x38] sm:$0xff] }
  0xbd   : > { %v641_v22 = vld [vmem:[%s1383_s23] sm:$0x3] }
  0xbe   : > { %v627_v23 = vadd.f32 %v1036_v14, %v622_v15  ;;  %v628_v24 = vadd.f32 %v1037_v17, %v623_v16  ;;  %v642_v25 = vcvt.s32.f32 %v641_v22  ;;  %v645_v26 = vsub.s32 1, %v636_v18 }
  0xbf   : > { %v652_v27 = vsub.s32 0, %v636_v18 }
  0xc0   : > { %v632_v28 = vadd.f32 %v1038_v20, %v627_v23  ;;  %v633_v29 = vadd.f32 %v1039_v21, %v628_v24  ;;  %v637_v30 = vstv %s634_s16  ;;  %v646_v31 = vrot.slane %v641_v22, %v645_v26 }
  0xc1   : > { %vm638_vm1 = vcmp.lt.s32.totalorder %v636_v18, %v637_v30  ;;  %v653_v32 = vrot.slane %v642_v25, %v652_v27 }
  0xc2   : > { %v1081_v33 = vpack.c.bf16 %v633_v29, %v632_v28  ;;  %vm647_vm2 = vcmp.eq.s32.totalorder %v646_v31, %v636_v18  ;;  %v1040_v34 = vsel %vm638_vm1, 1.0, %v1244_v19 }
  0xc3   : > { %v1041_v35 = vsel %vm647_vm2, 1.0, %v1244_v19 }
  0xc4   : > { %1082 = vmatpush3.bf16.msra.mxu0 %v1081_v33  ;;  %v654_v36 = vmul.f32 %v1041_v35, %v653_v32 }
  0xc6   : > { %v655_v37 = vmul.f32 %v1040_v34, %v654_v36 }
  0xc8   : > { %v656_v38 = vmul.f32 0.25, %v655_v37 }
  0xca   : > { %1078 = vmatmul.mubr.msk.f32.vlgmr.msra.gmra.mrb[0].mxu0 %vm657_vm3, %v656_v38 }
 0x19d   : > { %v727_v39 = vpop.f32.mrb[0].mxu0 }
 0x19e   : > { %731 = vst [vmem:[%s1388_s26 + $0x8] sm:$0xff] %v727_v39  ;;  %v1079_v40 = vpop.f32.mrb[1].mxu0 }
 0x19f   : > { %1205 = dma.done.wait [#allocation3], 16 }
 0x1a0   : > { %1206 = vsyncadd [#allocation3], 4294967280 }
 0x1a1   : > { %1207 = dma.done.wait [#allocation3 + $0x1], 16 }
 0x1a2   : > { %1208 = vsyncadd [#allocation3 + $0x1], 4294967280 }
 0x1a3   : > { %1209 = dma.done.wait [#allocation3 + $0x2], 16 }
 0x1a4   : > { %1210 = vsyncadd [#allocation3 + $0x2], 4294967280 }
 0x1a5   : > { %1211 = dma.done.wait [#allocation3 + $0x3], 16 }
 0x1a6   : > { %1212 = vsyncadd [#allocation3 + $0x3], 4294967280 }
 0x1a7   : > { %1213 = dma.done.wait [#allocation3 + $0x4], 16 }
 0x1a8   : > { %1214 = vsyncadd [#allocation3 + $0x4], 4294967280 }
 0x1a9   : > { %1215 = dma.done.wait [#allocation3 + $0x5], 16 }
 0x1aa   : > { %1216 = vsyncadd [#allocation3 + $0x5], 4294967280 }
 0x1ab   : > { %1217 = dma.done.wait [#allocation3 + $0x6], 16 }
 0x1ac   : > { %1218 = vsyncadd [#allocation3 + $0x6], 4294967280 }
 0x1ad   : > { %1219 = dma.done.wait [#allocation3 + $0x7], 16 }
 0x1ae   : > { %1220 = vsyncadd [#allocation3 + $0x7], 4294967280  ;;  %v749_v41 = vld [vmem:[#allocation2] sm:$0xff] }
 0x1af   : > { %v750_v42 = vmul.f32 %v1040_v34, %v749_v41 }
 0x1b1   : > { %751 = vst [vmem:[%s1388_s26] sm:$0xff] %v750_v42 }
 0x1b2 PF: > { %p25_p1 = scmp.ge.s32.totalorder %s1303_s6, 4   ;;  %s1455_s1 = smov %s1227_s27 }
 0x1b3   : > { %s1456_s27 = smov %s1231_s28  ;;  %s1457_s28 = smov %s1313_s9 }
 0x1b4   : > { %s1458_s29 = smov %s1303_s6  ;;  %27 = sbr.rel (!%p25_p1) target bundleno = 28 (0x1c), region = 423 }
 0x1bb   :  { %774 = vsyncpa [#allocation8], 1 }
 0x1bc   :  { %776 = vsyncpa [#allocation8 + $0x1], 1 }
 0x1bd   :  { %777 = vsyncmov [#allocation3] }
 0x1c0   :  { %s778_s30 = vpop.sfrf %777 }
 0x1c1   :  { %p1045_p2 = scmp.ne.s32.totalorder %s778_s30, 0 }
 0x1c3   :  { %782 = shalt.err (%p1045_p2)  }
 0x1c4   :  { %784 = vsyncmov [#allocation3 + $0x1] }
 0x1c7   :  { %s785_s17 = vpop.sfrf %784 }
 0x1c8   :  { %p1046_p6 = scmp.ne.s32.totalorder %s785_s17, 0 }
 0x1ca   :  { %789 = shalt.err (%p1046_p6)  }
 0x1cb   :  { %791 = vsyncmov [#allocation3 + $0x2] }
 0x1ce   :  { %s792_s23 = vpop.sfrf %791 }
 0x1cf   :  { %p1047_p8 = scmp.ne.s32.totalorder %s792_s23, 0 }
 0x1d1   :  { %796 = shalt.err (%p1047_p8)  }
 0x1d2   :  { %798 = vsyncmov [#allocation3 + $0x3] }
 0x1d5   :  { %s799_s26 = vpop.sfrf %798 }
 0x1d6   :  { %p1048_p10 = scmp.ne.s32.totalorder %s799_s26, 0 }
 0x1d8   :  { %803 = shalt.err (%p1048_p10)  }
 0x1d9   :  { %805 = vsyncmov [#allocation3 + $0x4] }
 0x1dc   :  { %s806_s6 = vpop.sfrf %805 }
 0x1dd   :  { %p1049_p11 = scmp.ne.s32.totalorder %s806_s6, 0 }
 0x1df   :  { %810 = shalt.err (%p1049_p11)  }
 0x1e0   :  { %812 = vsyncmov [#allocation3 + $0x5] }
 0x1e3   :  { %s813_s2 = vpop.sfrf %812 }
 0x1e4   :  { %p1050_p12 = scmp.ne.s32.totalorder %s813_s2, 0 }
 0x1e6   :  { %817 = shalt.err (%p1050_p12)  }
 0x1e7   :  { %819 = vsyncmov [#allocation3 + $0x6] }
 0x1ea   :  { %s820_s3 = vpop.sfrf %819 }
 0x1eb   :  { %p1051_p7 = scmp.ne.s32.totalorder %s820_s3, 0 }
 0x1ed   :  { %824 = shalt.err (%p1051_p7)  }
 0x1ee   :  { %826 = vsyncmov [#allocation3 + $0x7] }
 0x1f1   :  { %s827_s4 = vpop.sfrf %826 }
 0x1f2   :  { %p1052_p9 = scmp.ne.s32.totalorder %s827_s4, 0 }
 0x1f4   :  { %831 = shalt.err (%p1052_p9)  }

</bundles_post_ra>
